<compile_context>
chip_gen: v5e
topology: v5e:2x2
jax: 0.10.0
libtpu: 0.0.40
codegen_flags: <defaults>
</compile_context>

<pallas_src>
import math

import numpy as np
import jax
import jax.numpy as jnp
from jax import lax
from jax.experimental import pallas as pl
from jax.experimental.pallas import tpu as pltpu


def _round_up(v, m):
    return (v + m - 1) // m * m


def _pick_tile(padded_dim, cap):
    """Largest multiple of 128, <= cap, that divides padded_dim (padded_dim % 128 == 0)."""
    t = min(cap, padded_dim)
    while padded_dim % t:
        t -= 128
    return t


# ---------------------------------------------------------------------------
# Kernels
# ---------------------------------------------------------------------------
def _noisy_linear_train_kernel(x_ref, xe_ref, wmu_ref, wsig_ref, eout_ref,
                               bmu_ref, bsig_ref, o_ref, acc_ref):
    k = pl.program_id(2)

    @pl.when(k == 0)
    def _():
        acc_ref[...] = jnp.zeros_like(acc_ref)

    # x (tm, tk) contracted with W (tn, tk) on the last dim of both operands
    # -> (tm, tn).  No transpose / relayout, no w_eff materialization.
    mu = lax.dot_general(x_ref[...], wmu_ref[...],
                         dimension_numbers=(((1,), (1,)), ((), ())),
                         preferred_element_type=jnp.float32)
    sig = lax.dot_general(xe_ref[...], wsig_ref[...],
                          dimension_numbers=(((1,), (1,)), ((), ())),
                          preferred_element_type=jnp.float32)
    # eps_out scales the sigma contribution per output column (O(tm*tn) VPU).
    acc_ref[...] += mu + sig * eout_ref[...]

    @pl.when(k == pl.num_programs(2) - 1)
    def _():
        b_eff = bmu_ref[...] + bsig_ref[...] * eout_ref[...]      # (1, tn)
        o_ref[...] = (acc_ref[...] + b_eff).astype(o_ref.dtype)


def _linear_eval_kernel(x_ref, wmu_ref, bmu_ref, o_ref, acc_ref):
    k = pl.program_id(2)

    @pl.when(k == 0)
    def _():
        acc_ref[...] = jnp.zeros_like(acc_ref)

    acc_ref[...] += lax.dot_general(x_ref[...], wmu_ref[...],
                                    dimension_numbers=(((1,), (1,)), ((), ())),
                                    preferred_element_type=jnp.float32)

    @pl.when(k == pl.num_programs(2) - 1)
    def _():
        o_ref[...] = (acc_ref[...] + bmu_ref[...]).astype(o_ref.dtype)


# ---------------------------------------------------------------------------
# Parameter packing (pad + cast hoisted out of the hot path, done once)
# ---------------------------------------------------------------------------
def pack_noisy_linear_params(weight_mu, weight_sigma, bias_mu, bias_sigma,
                             *, weight_dtype=jnp.bfloat16):
    out_f, in_f = weight_mu.shape
    Np = _round_up(out_f, 128)
    Kp = _round_up(in_f, 128)
    tn = 128                    # >= 2 j-tiles whenever out_f > 128 (v7x megacore)
    tk = _pick_tile(Kp, 512)

    def pad_w(w):
        w = w.astype(weight_dtype)
        return jnp.pad(w, ((0, Np - out_f), (0, Kp - in_f)))

    def pad_row(b):
        b = b.reshape(1, out_f).astype(jnp.float32)
        return jnp.pad(b, ((0, 0), (0, Np - out_f)))

    return dict(
        weight_mu=pad_w(weight_mu),
        weight_sigma=pad_w(weight_sigma),
        bias_mu=pad_row(bias_mu),
        bias_sigma=pad_row(bias_sigma),
        in_features=in_f, out_features=out_f,
        Np=Np, Kp=Kp, tn=tn, tk=tk,
        weight_dtype=jnp.dtype(weight_dtype),
    )


# ---------------------------------------------------------------------------
# Forward wrapper
# ---------------------------------------------------------------------------
def noisy_linear_forward(x, params, eps_in, eps_out, *, training=True,
                         weight_buffers=2):
    """Pallas NoisyLinear forward.

    Noise is passed factored (eps_in: (in_f,), eps_out: (out_f,)), exactly as
    the PyTorch module generates it in sample_noise(); the eps_out x eps_in
    outer product is never materialized.
    """
    B, in_f = x.shape
    assert in_f == params["in_features"]
    out_f = params["out_features"]
    Np, Kp = params["Np"], params["Kp"]
    tn, tk = params["tn"], params["tk"]
    w_dt = params["weight_dtype"]
    out_dtype = x.dtype

    sub = 16 if jnp.dtype(w_dt).itemsize < 4 else 8
    tm = min(_round_up(B, sub), 1024)
    Mp = _round_up(B, tm)
    grid = (Mp // tm, Np // tn, Kp // tk)

    x32 = x.astype(jnp.float32)
    x_p = jnp.pad(x32, ((0, Mp - B), (0, Kp - in_f))).astype(w_dt)

    x_spec = pl.BlockSpec((tm, tk), lambda i, j, k: (i, k))
    rowN_spec = pl.BlockSpec((1, tn), lambda i, j, k: (0, j))
    out_spec = pl.BlockSpec((tm, tn), lambda i, j, k: (i, j))

    def w_spec():
        idx = lambda i, j, k: (j, k)
        if weight_buffers and weight_buffers > 2:
            return pl.BlockSpec((tn, tk), idx,
                                pipeline_mode=pl.Buffered(weight_buffers))
        return pl.BlockSpec((tn, tk), idx)

    n_streams = 2 if training else 1
    elt_w = jnp.dtype(w_dt).itemsize
    i_tiles, j_tiles = grid[0], grid[1]

    # VMEM budget: double-buffered x / weight / output tiles + f32 accumulator.
    tile_bytes = (2 * (n_streams * tm * tk * elt_w
                       + max(2, weight_buffers) // 2 * n_streams * tn * tk * elt_w
                       + tm * tn * jnp.dtype(out_dtype).itemsize)
                  + tm * tn * 4
                  + 2 * 4 * tn * (3 if training else 1))
    vmem_limit_bytes = int(min(max(2 * tile_bytes, 8 << 20), 48 << 20))

    flops = 2 * n_streams * Mp * Np * Kp + (Mp * Np * grid[2] if training else 0)
    bytes_accessed = (n_streams * elt_w * Mp * Kp * j_tiles       # x (+ x*eps_in), refetched per j
                      + n_streams * elt_w * Np * Kp * i_tiles     # weights, refetched per i
                      + jnp.dtype(out_dtype).itemsize * Mp * Np
                      + 4 * Np * (3 if training else 1))
    cost = pl.CostEstimate(flops=int(flops), transcendentals=0,
                           bytes_accessed=int(bytes_accessed))

    compiler_params = pltpu.CompilerParams(
        dimension_semantics=("parallel", "parallel", "arbitrary"),
        vmem_limit_bytes=vmem_limit_bytes)

    if training:
        # Pre-scale x by eps_in (O(B*K), negligible) -> no in-kernel outer product.
        xe_p = jnp.pad(x32 * eps_in.astype(jnp.float32)[None, :],
                       ((0, Mp - B), (0, Kp - in_f))).astype(w_dt)
        eout_p = jnp.pad(eps_out.reshape(1, out_f).astype(jnp.float32),
                         ((0, 0), (0, Np - out_f)))
        kern = _noisy_linear_train_kernel
        in_specs = [x_spec, x_spec, w_spec(), w_spec(),
                    rowN_spec, rowN_spec, rowN_spec]
        args = (x_p, xe_p, params["weight_mu"], params["weight_sigma"],
                eout_p, params["bias_mu"], params["bias_sigma"])
    else:
        kern = _linear_eval_kernel
        in_specs = [x_spec, w_spec(), rowN_spec]
        args = (x_p, params["weight_mu"], params["bias_mu"])

    out_p = pl.pallas_call(
        kern,
        out_shape=jax.ShapeDtypeStruct((Mp, Np), out_dtype),
        grid_spec=pltpu.PrefetchScalarGridSpec(
            num_scalar_prefetch=0,
            grid=grid,
            in_specs=in_specs,
            out_specs=out_spec,
            scratch_shapes=[pltpu.VMEM((tm, tn), jnp.float32)]),
        compiler_params=compiler_params,
        cost_estimate=cost,
    )(*args)

    return out_p[:B, :out_f]


# ---------------------------------------------------------------------------
# Deterministic parameter / noise initialization mirroring the PyTorch module.
# TODO(synk): noise sampling (sample_noise) is done host-side with jax.random,
# not inside the kernel, matching the module's buffer-based noise.
# ---------------------------------------------------------------------------
def _scale_noise(key, size):
    n = jax.random.normal(key, (size,), dtype=jnp.float32)
    return jnp.sign(n) * jnp.sqrt(jnp.abs(n))


def init_noisy_linear(key, in_features, out_features, std_init=0.4):
    k_wmu, k_bmu, k_ein, k_eout = jax.random.split(key, 4)
    mu_range = 1.0 / math.sqrt(in_features)

    weight_mu = jax.random.uniform(
        k_wmu, (out_features, in_features), jnp.float32, -mu_range, mu_range)
    weight_sigma = jnp.full((out_features, in_features),
                            std_init / math.sqrt(in_features), jnp.float32)
    bias_mu = jax.random.uniform(
        k_bmu, (out_features,), jnp.float32, -mu_range, mu_range)
    bias_sigma = jnp.full((out_features,),
                          std_init / math.sqrt(out_features), jnp.float32)

    eps_in = _scale_noise(k_ein, in_features)      # factored noise, as in
    eps_out = _scale_noise(k_eout, out_features)   # NoisyLinear.sample_noise

    return weight_mu, weight_sigma, bias_mu, bias_sigma, eps_in, eps_out


if __name__ == "__main__":
    key = jax.random.PRNGKey(0)
    k_params, k_x = jax.random.split(key)

    B, IN_F, OUT_F = 2, 32, 64
    wmu, wsig, bmu, bsig, eps_in, eps_out = init_noisy_linear(
        k_params, IN_F, OUT_F, std_init=0.4)
    x = jax.random.normal(k_x, (B, IN_F), dtype=jnp.float32)

    # ---------------- float64 references (numpy, precision-unambiguous) -----
    def f64(a):
        return np.asarray(jnp.asarray(a, jnp.float32), dtype=np.float64)

    x64, wmu64, wsig64 = f64(x), f64(wmu), f64(wsig)
    bmu64, bsig64 = f64(bmu), f64(bsig)
    ein64, eout64 = f64(eps_in), f64(eps_out)

    w_eps64 = np.outer(eout64, ein64)
    ref_train = x64 @ (wmu64 + wsig64 * w_eps64).T + (bmu64 + bsig64 * eout64)
    ref_eval = x64 @ wmu64.T + bmu64

    # bf16-quantized reference (mirrors the kernel's bf16 operands, f32 accum).
    def q_bf16(a):
        return np.asarray(jnp.asarray(a, jnp.float32).astype(jnp.bfloat16)
                          .astype(jnp.float32), dtype=np.float64)

    xq, xeq = q_bf16(x), q_bf16(x * eps_in[None, :])
    wmuq, wsigq = q_bf16(wmu), q_bf16(wsig)
    ref_train_bf = (xq @ wmuq.T + eout64[None, :] * (xeq @ wsigq.T)
                    + bmu64 + bsig64 * eout64)
    ref_eval_bf = xq @ wmuq.T + bmu64

    # ---------------- f32-weight path: tight check ---------------------------
    p32 = pack_noisy_linear_params(wmu, wsig, bmu, bsig,
                                   weight_dtype=jnp.float32)
    out_tr32 = jax.block_until_ready(
        noisy_linear_forward(x, p32, eps_in, eps_out, training=True))
    out_ev32 = jax.block_until_ready(
        noisy_linear_forward(x, p32, eps_in, eps_out, training=False))

    assert out_tr32.shape == (B, OUT_F) and out_ev32.shape == (B, OUT_F)
    assert np.allclose(np.asarray(out_tr32, np.float64), ref_train,
                       atol=1e-3, rtol=1e-3)
    assert np.allclose(np.asarray(out_ev32, np.float64), ref_eval,
                       atol=1e-3, rtol=1e-3)

    # ---------------- bf16-weight path (default perf config) -----------------
    pbf = pack_noisy_linear_params(wmu, wsig, bmu, bsig)   # bf16 weights
    out_tr = jax.block_until_ready(
        noisy_linear_forward(x, pbf, eps_in, eps_out, training=True))
    out_ev = jax.block_until_ready(
        noisy_linear_forward(x, pbf, eps_in, eps_out, training=False))

    assert out_tr.shape == (B, OUT_F) and out_ev.shape == (B, OUT_F)
    # Tight vs. bf16-quantized reference (same arithmetic as the kernel).
    assert np.allclose(np.asarray(out_tr, np.float64), ref_train_bf,
                       atol=1e-3, rtol=1e-3)
    assert np.allclose(np.asarray(out_ev, np.float64), ref_eval_bf,
                       atol=1e-3, rtol=1e-3)
    # Loose sanity vs. full-precision reference (expected bf16 quantization).
    assert np.allclose(np.asarray(out_tr, np.float64), ref_train,
                       atol=1e-1, rtol=1e-1)
    assert np.allclose(np.asarray(out_ev, np.float64), ref_eval,
                       atol=1e-1, rtol=1e-1)

    print("KERNEL_OK")
</pallas_src>

<mosaic_0001>
module attributes {stable_mosaic.version = 11 : i64} {
  func.func @_noisy_linear_train_kernel(%arg0: i32, %arg1: i32, %arg2: i32, %arg3: memref<8x128xf32, #tpu.memory_space<vmem>>, %arg4: memref<8x128xf32, #tpu.memory_space<vmem>>, %arg5: memref<128x128xf32, #tpu.memory_space<vmem>>, %arg6: memref<128x128xf32, #tpu.memory_space<vmem>>, %arg7: memref<1x128xf32, #tpu.memory_space<vmem>>, %arg8: memref<1x128xf32, #tpu.memory_space<vmem>>, %arg9: memref<1x128xf32, #tpu.memory_space<vmem>>, %arg10: memref<8x128xf32, #tpu.memory_space<vmem>>, %arg11: memref<8x128xf32, #tpu.memory_space<vmem>>) attributes {dimension_semantics = [#tpu.dimension_semantics<parallel>, #tpu.dimension_semantics<parallel>, #tpu.dimension_semantics<arbitrary>], iteration_bounds = array<i64: 1, 1, 1>, scalar_prefetch = 0 : i64, scratch_operands = 1 : i64, tpu.core_type = #tpu.core_type<tc>, window_params = [{transform_indices = @transform_0, window_bounds = array<i64: 8, 128>}, {transform_indices = @transform_1, window_bounds = array<i64: 8, 128>}, {transform_indices = @transform_2, window_bounds = array<i64: 128, 128>}, {transform_indices = @transform_3, window_bounds = array<i64: 128, 128>}, {transform_indices = @transform_4, window_bounds = array<i64: 1, 128>}, {transform_indices = @transform_5, window_bounds = array<i64: 1, 128>}, {transform_indices = @transform_6, window_bounds = array<i64: 1, 128>}, {transform_indices = @transform_7, window_bounds = array<i64: 8, 128>}]} {
    %c0_i32 = arith.constant 0 : i32
    %0 = arith.cmpi eq, %arg2, %c0_i32 : i32
    %1 = arith.extui %0 : i1 to i32
    %c0_i32_0 = arith.constant 0 : i32
    %2 = arith.cmpi ne, %1, %c0_i32_0 : i32
    scf.if %2 {
      %cst_17 = arith.constant 0.000000e+00 : f32
      %19 = vector.broadcast %cst_17 : f32 to vector<8x128xf32>
      %c0_18 = arith.constant 0 : index
      %c0_19 = arith.constant 0 : index
      %20 = vector.load %arg11[%c0_18, %c0_19] : memref<8x128xf32, #tpu.memory_space<vmem>>, vector<8x128xf32>
      tpu.vector_store %arg11[%c0_18, %c0_19], %19 {strides = array<i32>} : memref<8x128xf32, #tpu.memory_space<vmem>>, vector<8x128xf32>,
    } else {
    }
    %c0 = arith.constant 0 : index
    %c0_1 = arith.constant 0 : index
    %3 = vector.load %arg3[%c0, %c0_1] : memref<8x128xf32, #tpu.memory_space<vmem>>, vector<8x128xf32>
    %c0_2 = arith.constant 0 : index
    %c0_3 = arith.constant 0 : index
    %4 = vector.load %arg5[%c0_2, %c0_3] : memref<128x128xf32, #tpu.memory_space<vmem>>, vector<128x128xf32>
    %cst = arith.constant dense<0.000000e+00> : vector<8x128xf32>
    %5 = tpu.matmul %3, %4, %cst {dimension_numbers = #tpu.dot_dimension_numbers<[1], [1], [0], [0], [0, 0, 1, 0], [], []>} : vector<8x128xf32>, vector<128x128xf32>, vector<8x128xf32> -> vector<8x128xf32>
    %c0_4 = arith.constant 0 : index
    %c0_5 = arith.constant 0 : index
    %6 = vector.load %arg4[%c0_4, %c0_5] : memref<8x128xf32, #tpu.memory_space<vmem>>, vector<8x128xf32>
    %c0_6 = arith.constant 0 : index
    %c0_7 = arith.constant 0 : index
    %7 = vector.load %arg6[%c0_6, %c0_7] : memref<128x128xf32, #tpu.memory_space<vmem>>, vector<128x128xf32>
    %cst_8 = arith.constant dense<0.000000e+00> : vector<8x128xf32>
    %8 = tpu.matmul %6, %7, %cst_8 {dimension_numbers = #tpu.dot_dimension_numbers<[1], [1], [0], [0], [0, 0, 1, 0], [], []>} : vector<8x128xf32>, vector<128x128xf32>, vector<8x128xf32> -> vector<8x128xf32>
    %c0_9 = arith.constant 0 : index
    %c0_10 = arith.constant 0 : index
    %9 = vector.load %arg11[%c0_9, %c0_10] : memref<8x128xf32, #tpu.memory_space<vmem>>, vector<8x128xf32>
    %c0_11 = arith.constant 0 : index
    %c0_12 = arith.constant 0 : index
    %10 = vector.load %arg7[%c0_11, %c0_12] : memref<1x128xf32, #tpu.memory_space<vmem>>, vector<1x128xf32>
    %11 = vector.broadcast %10 : vector<1x128xf32> to vector<8x128xf32>
    %12 = arith.mulf %8, %11 : vector<8x128xf32>
    %13 = arith.addf %5, %12 : vector<8x128xf32>
    %14 = arith.addf %9, %13 : vector<8x128xf32>
    %c0_13 = arith.constant 0 : index
    %c0_14 = arith.constant 0 : index
    %15 = vector.load %arg11[%c0_13, %c0_14] : memref<8x128xf32, #tpu.memory_space<vmem>>, vector<8x128xf32>
    tpu.vector_store %arg11[%c0_13, %c0_14], %14 {strides = array<i32>} : memref<8x128xf32, #tpu.memory_space<vmem>>, vector<8x128xf32>,
    %c0_i32_15 = arith.constant 0 : i32
    %16 = arith.cmpi eq, %arg2, %c0_i32_15 : i32
    %17 = arith.extui %16 : i1 to i32
    %c0_i32_16 = arith.constant 0 : i32
    %18 = arith.cmpi ne, %17, %c0_i32_16 : i32
    scf.if %18 {
      %c0_17 = arith.constant 0 : index
      %c0_18 = arith.constant 0 : index
      %19 = vector.load %arg8[%c0_17, %c0_18] : memref<1x128xf32, #tpu.memory_space<vmem>>, vector<1x128xf32>
      %c0_19 = arith.constant 0 : index
      %c0_20 = arith.constant 0 : index
      %20 = vector.load %arg9[%c0_19, %c0_20] : memref<1x128xf32, #tpu.memory_space<vmem>>, vector<1x128xf32>
      %c0_21 = arith.constant 0 : index
      %c0_22 = arith.constant 0 : index
      %21 = vector.load %arg7[%c0_21, %c0_22] : memref<1x128xf32, #tpu.memory_space<vmem>>, vector<1x128xf32>
      %22 = arith.mulf %20, %21 : vector<1x128xf32>
      %23 = arith.addf %19, %22 : vector<1x128xf32>
      %c0_23 = arith.constant 0 : index
      %c0_24 = arith.constant 0 : index
      %24 = vector.load %arg11[%c0_23, %c0_24] : memref<8x128xf32, #tpu.memory_space<vmem>>, vector<8x128xf32>
      %25 = vector.broadcast %23 : vector<1x128xf32> to vector<8x128xf32>
      %26 = arith.addf %24, %25 : vector<8x128xf32>
      %c0_25 = arith.constant 0 : index
      %c0_26 = arith.constant 0 : index
      %27 = vector.load %arg10[%c0_25, %c0_26] : memref<8x128xf32, #tpu.memory_space<vmem>>, vector<8x128xf32>
      tpu.vector_store %arg10[%c0_25, %c0_26], %26 {strides = array<i32>} : memref<8x128xf32, #tpu.memory_space<vmem>>, vector<8x128xf32>,
    } else {
    }
    return
  }
  func.func @transform_0(%arg0: i32, %arg1: i32, %arg2: i32) -> (i32, i32) {
    %c0_i32 = arith.constant 0 : i32
    return %arg0, %arg2 : i32, i32
  }
  func.func @transform_1(%arg0: i32, %arg1: i32, %arg2: i32) -> (i32, i32) {
    %c0_i32 = arith.constant 0 : i32
    return %arg0, %arg2 : i32, i32
  }
  func.func @transform_2(%arg0: i32, %arg1: i32, %arg2: i32) -> (i32, i32) {
    %c0_i32 = arith.constant 0 : i32
    return %arg1, %arg2 : i32, i32
  }
  func.func @transform_3(%arg0: i32, %arg1: i32, %arg2: i32) -> (i32, i32) {
    %c0_i32 = arith.constant 0 : i32
    return %arg1, %arg2 : i32, i32
  }
  func.func @transform_4(%arg0: i32, %arg1: i32, %arg2: i32) -> (i32, i32) {
    %c0_i32 = arith.constant 0 : i32
    %c0_i32_0 = arith.constant 0 : i32
    return %c0_i32, %arg1 : i32, i32
  }
  func.func @transform_5(%arg0: i32, %arg1: i32, %arg2: i32) -> (i32, i32) {
    %c0_i32 = arith.constant 0 : i32
    %c0_i32_0 = arith.constant 0 : i32
    return %c0_i32, %arg1 : i32, i32
  }
  func.func @transform_6(%arg0: i32, %arg1: i32, %arg2: i32) -> (i32, i32) {
    %c0_i32 = arith.constant 0 : i32
    %c0_i32_0 = arith.constant 0 : i32
    return %c0_i32, %arg1 : i32, i32
  }
  func.func @transform_7(%arg0: i32, %arg1: i32, %arg2: i32) -> (i32, i32) {
    %c0_i32 = arith.constant 0 : i32
    return %arg0, %arg1 : i32, i32
  }
}

</mosaic_0001>

<bundles_post_ra>
// kernel: tpu_custom_call.1
= control target key start
LH: loop header
LB: loop body
LE: loop exit
PB: predicated region body
PF: predicated region fallthrough
CT: control target
= control target key end

     0   :  { %12 = vsyncpa [#allocation4], 0  ;;  %s416_s0 = inlined_call_operand.hbm [shape: f32[8,128], index: 0, kind: input, shape index: {}]   ;;  %s417_s1 = inlined_call_operand.hbm [shape: f32[8,128], index: 1, kind: input, shape index: {}]   ;;  %s418_s2 = inlined_call_operand.hbm [shape: f32[128,128], index: 2, kind: input, shape index: {}]   ;;  %s419_s3 = inlined_call_operand.hbm [shape: f32[128,128], index: 3, kind: input, shape index: {}]   ;;  %s420_s4 = inlined_call_operand.vmem [shape: f32[1,128], index: 4, kind: input, shape index: {}]   ;;  %s421_s5 = inlined_call_operand.vmem [shape: f32[1,128], index: 5, kind: input, shape index: {}]   ;;  %s422_s6 = inlined_call_operand.vmem [shape: f32[1,128], index: 6, kind: input, shape index: {}]   ;;  %s423_s7 = inlined_call_operand.hbm [shape: f32[8,128], index: 7, kind: output, shape index: {}]  }
   0x1   :  { %13 = vsyncpa [#allocation7], 0 }
   0x2   :  { %14 = vsyncpa [#allocation10], 0  ;;  %s32_s26 = sshll.u32 %s417_s1, 4  ;;  %s33_s26 = int_to_ptr.hbm [resolvable:$true] %s32_s26 }
   0x3   :  { %15 = vsyncpa [#allocation5], 0  ;;  %s342_s27 = smov [#allocation6]   ;;  %s21_s8 = sshll.u32 %s416_s0, 4  ;;  %s22_s8 = int_to_ptr.hbm [resolvable:$true] %s21_s8 }
   0x4   :  { %s34_s28 = sshll.u32 %s342_s27, 4  ;;  %s343_s9 = smov [#allocation3]   ;;  %s35_s28 = int_to_ptr.vmem [resolvable:$true] %s34_s28 }
   0x5   :  { %37 = dma.hbm_to_vmem [thread:$0]  %s33_s26, 128, %s35_s28, [#allocation7]  }
   0x6   :  { %s23_s10 = sshll.u32 %s343_s9, 4  ;;  %s42_s13 = sshll.u32 %s418_s2, 4  ;;  %s24_s10 = int_to_ptr.vmem [resolvable:$true] %s23_s10  ;;  %s43_s13 = int_to_ptr.hbm [resolvable:$true] %s42_s13 }
   0x7   :  { %26 = dma.hbm_to_vmem [thread:$0]  %s22_s8, 128, %s24_s10, [#allocation4]  }
   0x8   :  { %s344_s1 = smov [#allocation8]   ;;  %s55_s17 = sshll.u32 %s419_s3, 4  ;;  %s56_s17 = int_to_ptr.hbm [resolvable:$true] %s55_s17 }
   0x9   :  { %s44_s14 = sshll.u32 %s344_s1, 4  ;;  %s345_s18 = smov 128   ;;  %s45_s14 = int_to_ptr.vmem [resolvable:$true] %s44_s14 }
   0xa   :  { %s346_s0 = smov 8   ;;  %s347_s19 = smov [#allocation9]  }
   0xb   :  { %50 = dma.hbm_to_vmem [thread:$0]  %s43_s13, 2048, %s45_s14, [#allocation7], %s345_s18, %s345_s18, %s346_s0  }
   0xc   :  { %s57_s20 = sshll.u32 %s347_s19, 4  ;;  %s58_s20 = int_to_ptr.vmem [resolvable:$true] %s57_s20 }
   0xd   :  { %63 = dma.hbm_to_vmem [thread:$0]  %s56_s17, 2048, %s58_s20, [#allocation10], %s345_s18, %s345_s18, %s346_s0  }
   0xe   :  { %334 = dma.done.wait [#allocation4], 128  }
   0xf   :  { %335 = vsyncadd [#allocation4], 4294967168 }
  0x10   :  { %336 = dma.done.wait [#allocation7], 2176  }
  0x11   :  { %337 = vsyncadd [#allocation7], 4294965120 }
  0x12   :  { %338 = dma.done.wait [#allocation10], 2048  }
  0x13   :  { %339 = vsyncadd [#allocation10], 4294965248  ;;  %v124_v0 = vld [vmem:[#allocation9 + $0x78] sm:$0xff]  ;;  %v123_v2 = vld [vmem:[#allocation9 + $0x70] sm:$0xff]  ;;  %s348_s27 = smov [#allocation11]   ;;  %s194_s30 = sshll.u32 %s423_s7, 4  ;;  %s195_s30 = int_to_ptr.hbm [resolvable:$true] %s194_s30 }
  0x14   :  { %v107_v1 = vld [vmem:[#allocation8 + $0x78] sm:$0xff]  ;;  %125 = vmatpush.xpose.msra.mxu0 %v124_v0  ;;  %v106_v3 = vld [vmem:[#allocation8 + $0x70] sm:$0xff]  ;;  %v122_v4 = vld [vmem:[#allocation9 + $0x68] sm:$0xff] }
  0x15   :  { %151 = vmatpush.xpose.msra.mxu1 %v107_v1  ;;  %v105_v5 = vld [vmem:[#allocation8 + $0x68] sm:$0xff]  ;;  %v121_v6 = vld [vmem:[#allocation9 + $0x60] sm:$0xff]  ;;  %v120_v8 = vld [vmem:[#allocation9 + $0x58] sm:$0xff] }
  0x16   :  { %v104_v7 = vld [vmem:[#allocation8 + $0x60] sm:$0xff]  ;;  %v103_v9 = vld [vmem:[#allocation8 + $0x58] sm:$0xff]  ;;  %v119_v10 = vld [vmem:[#allocation9 + $0x50] sm:$0xff] }
  0x17   :  { %v102_v11 = vld [vmem:[#allocation8 + $0x50] sm:$0xff]  ;;  %v118_v12 = vld [vmem:[#allocation9 + $0x48] sm:$0xff]  ;;  %v117_v14 = vld [vmem:[#allocation9 + $0x40] sm:$0xff] }
  0x18   :  { %126 = vmatpush.xpose.msra.mxu0 %v123_v2  ;;  %v101_v13 = vld [vmem:[#allocation8 + $0x48] sm:$0xff]  ;;  %v100_v15 = vld [vmem:[#allocation8 + $0x40] sm:$0xff]  ;;  %v116_v16 = vld [vmem:[#allocation9 + $0x38] sm:$0xff] }
  0x19   :  { %152 = vmatpush.xpose.msra.mxu1 %v106_v3  ;;  %v99_v17 = vld [vmem:[#allocation8 + $0x38] sm:$0xff]  ;;  %v115_v18 = vld [vmem:[#allocation9 + $0x30] sm:$0xff]  ;;  %v114_v20 = vld [vmem:[#allocation9 + $0x28] sm:$0xff] }
  0x1a   :  { %v98_v19 = vld [vmem:[#allocation8 + $0x30] sm:$0xff]  ;;  %v97_v21 = vld [vmem:[#allocation8 + $0x28] sm:$0xff]  ;;  %v113_v22 = vld [vmem:[#allocation9 + $0x20] sm:$0xff] }
  0x1b   :  { %v96_v23 = vld [vmem:[#allocation8 + $0x20] sm:$0xff]  ;;  %v112_v24 = vld [vmem:[#allocation9 + $0x18] sm:$0xff]  ;;  %v111_v26 = vld [vmem:[#allocation9 + $0x10] sm:$0xff] }
  0x1c   :  { %127 = vmatpush.xpose.msra.mxu0 %v122_v4  ;;  %v95_v25 = vld [vmem:[#allocation8 + $0x18] sm:$0xff]  ;;  %v94_v27 = vld [vmem:[#allocation8 + $0x10] sm:$0xff]  ;;  %v110_v28 = vld [vmem:[#allocation9 + $0x8] sm:$0xff] }
  0x1d   :  { %153 = vmatpush.xpose.msra.mxu1 %v105_v5  ;;  %v93_v29 = vld [vmem:[#allocation8 + $0x8] sm:$0xff]  ;;  %v109_v30 = vld [vmem:[#allocation9] sm:$0xff]  ;;  %v108_v32 = vld [vmem:[#allocation6] sm:$0xff] }
  0x1e   :  { %v92_v31 = vld [vmem:[#allocation8] sm:$0xff]  ;;  %v91_v33 = vld [vmem:[#allocation3] sm:$0xff] }
  0x1f   :  { %v177_v34 = vld [vmem:[%s422_s6] sm:$0x1]  ;;  %s192_s6 = sshll.u32 %s348_s27, 4  ;;  %s193_s6 = int_to_ptr.vmem [resolvable:$true] %s192_s6 }
  0x20   :  { %128 = vmatpush.xpose.msra.mxu0 %v121_v6  ;;  %v178_v35 = vld [vmem:[%s420_s4] sm:$0x1] }
  0x21   :  { %154 = vmatpush.xpose.msra.mxu1 %v104_v7  ;;  %v179_v36 = vmul.f32 %v178_v35, %v177_v34  ;;  %v176_v37 = vld [vmem:[%s421_s5] sm:$0x1] }
  0x22   :  { %v213_v38 = vld [vmem:[%s420_s4] ss:$0 sm:$0xff] }
  0x23   :  { %v180_v39 = vadd.f32 %v179_v36, %v176_v37 }
  0x24   :  { %129 = vmatpush.xpose.msra.mxu0 %v120_v8 }
  0x25   :  { %155 = vmatpush.xpose.msra.mxu1 %v103_v9  ;;  %v183_v43 = vperm.slane %v180_v39, 0 }
  0x28   :  { %130 = vmatpush.xpose.msra.mxu0 %v119_v10 }
  0x29   :  { %156 = vmatpush.xpose.msra.mxu1 %v102_v11 }
  0x2c   :  { %131 = vmatpush.xpose.msra.mxu0 %v118_v12 }
  0x2d   :  { %157 = vmatpush.xpose.msra.mxu1 %v101_v13 }
  0x30   :  { %132 = vmatpush.xpose.msra.mxu0 %v117_v14 }
  0x31   :  { %158 = vmatpush.xpose.msra.mxu1 %v100_v15 }
  0x34   :  { %133 = vmatpush.xpose.msra.mxu0 %v116_v16 }
  0x35   :  { %159 = vmatpush.xpose.msra.mxu1 %v99_v17 }
  0x38   :  { %134 = vmatpush.xpose.msra.mxu0 %v115_v18 }
  0x39   :  { %160 = vmatpush.xpose.msra.mxu1 %v98_v19 }
  0x3c   :  { %135 = vmatpush.xpose.msra.mxu0 %v114_v20 }
  0x3d   :  { %161 = vmatpush.xpose.msra.mxu1 %v97_v21 }
  0x40   :  { %136 = vmatpush.xpose.msra.mxu0 %v113_v22 }
  0x41   :  { %162 = vmatpush.xpose.msra.mxu1 %v96_v23 }
  0x44   :  { %137 = vmatpush.xpose.msra.mxu0 %v112_v24 }
  0x45   :  { %163 = vmatpush.xpose.msra.mxu1 %v95_v25 }
  0x48   :  { %138 = vmatpush.xpose.msra.mxu0 %v111_v26 }
  0x49   :  { %164 = vmatpush.xpose.msra.mxu1 %v94_v27 }
  0x4c   :  { %139 = vmatpush.xpose.msra.mxu0 %v110_v28 }
  0x4d   :  { %165 = vmatpush.xpose.msra.mxu1 %v93_v29 }
  0x50   :  { %140 = vmatpush.xpose.msra.mxu0 %v109_v30 }
  0x51   :  { %166 = vmatpush.xpose.msra.mxu1 %v92_v31 }
  0x53   :  { %141 = vmatmul.f32.vlgmr.msra.gmra.mxu0 %v108_v32 }
  0x54   :  { %167 = vmatmul.f32.vlgmr.msra.gmra.mxu1 %v91_v33 }
  0xd0   :  { %v142_v40 = vpop.f32.mrf.mxu0 }
  0xd1   :  { %v168_v41 = vpop.f32.mrf.mxu1  ;;  %v150_v42 = vmul.f32 %v213_v38, %v142_v40 }
  0xd3   :  { %v169_v44 = vadd.f32 %v168_v41, %v150_v42 }
  0xd5   :  { %v185_v45 = vadd.f32 %v183_v43, %v169_v44 }
  0xd7   :  { %186 = vst [vmem:[#allocation11] sm:$0xff] %v185_v45 }
  0xd8   :  { %197 = dma.vmem_to_hbm [thread:$0]  %s193_s6, 128, %s195_s30, [#allocation5]  }
  0xd9   :  { %340 = dma.done.wait [#allocation5], 128  }
  0xda   :  { %341 = vsyncadd [#allocation5], 4294967168 }
  0xdb   :  { %202 = vsyncpa [#allocation4], 1 }
  0xdc   :  { %203 = vsyncpa [#allocation7], 1 }
  0xdd   :  { %204 = vsyncpa [#allocation10], 1 }
  0xde   :  { %205 = vsyncpa [#allocation5], 1 }

</bundles_post_ra>
